<compile_context>
chip_gen: v7x
topology: tpu7x:2x2x1
jax: 0.10.0
libtpu: 0.0.40
codegen_flags: <defaults>
</compile_context>

<pallas_src>
import functools

import numpy as np

import jax
import jax.numpy as jnp
from jax.experimental import pallas as pl
from jax.experimental.pallas import tpu as pltpu


# ----------------------------------------------------------------------------- kernel
def _pointnet_feature_kernel(y_ref,                 # VMEM (f_tile*M_pad, 8) f32
                             w1_ref, b1_ref,        # (8, 64) f32, (1, 64) f32
                             w2_ref, b2_ref,        # (64, 128) bf16, (1, 128) f32
                             w3_ref, b3_ref,        # (128, 512) bf16, (1, 512) f32
                             f_ref,                 # VMEM out (f_tile, 512) f32
                             *, m, chunk_frames):
    f_tile, feat = f_ref.shape
    n_chunks = f_tile // chunk_frames
    chunk_rows = chunk_frames * m

    w1 = w1_ref[...]
    b1 = b1_ref[...]
    w2 = w2_ref[...]
    b2 = b2_ref[...]
    w3 = w3_ref[...]
    b3 = b3_ref[...]

    def compute_chunk(r0, f0):
        x = y_ref[pl.ds(r0, chunk_rows), :]                       # (chunk_rows, 8) f32
        # layer 1 (8 -> 64): small-K matmul, f32 operands/accumulation.
        h = jnp.dot(x, w1, preferred_element_type=jnp.float32) + b1
        h = jnp.maximum(h, 0.0)                                    # (chunk_rows, 64)
        # layers 2/3 on the MXU: bf16 operands, f32 accumulation (bias/ReLU in f32).
        h = jnp.dot(h.astype(jnp.bfloat16), w2,
                    preferred_element_type=jnp.float32) + b2
        h = jnp.maximum(h, 0.0)                                    # (chunk_rows, 128)
        h = jnp.dot(h.astype(jnp.bfloat16), w3,
                    preferred_element_type=jnp.float32) + b3
        h = jnp.maximum(h, 0.0)                                    # (chunk_rows, 512)
        # per-frame max-pool over the m points (aligned sublane reduction, m % 8 == 0),
        # stored as one lane-dense (chunk_frames, 512) slab.
        pooled = jnp.max(h.reshape(chunk_frames, m, feat), axis=1)
        f_ref[pl.ds(f0, chunk_frames), :] = pooled

    if n_chunks == 1:
        compute_chunk(0, 0)
    else:
        # multi-chunk path: chunk_frames is a multiple of 8 by construction.
        def body(c, carry):
            r0 = pl.multiple_of(c * chunk_rows, 8)
            f0 = pl.multiple_of(c * chunk_frames, 8)
            compute_chunk(r0, f0)
            return carry
        jax.lax.fori_loop(0, n_chunks, body, None, unroll=(n_chunks <= 8))


# ----------------------------------------------------------------------------- tiling
_GEN_CFG = {
    # single TensorCore, 128 MiB physical VMEM (v5e scoped default is only 16 MiB)
    "v5": dict(rows_cap=8192, min_steps=1, vmem_limit=64 * 1024 * 1024),
    "v6": dict(rows_cap=8192, min_steps=1, vmem_limit=64 * 1024 * 1024),
    # 2 TensorCores per chip, 64 MiB physical VMEM per TC
    "v7": dict(rows_cap=4096, min_steps=2, vmem_limit=40 * 1024 * 1024),
    "default": dict(rows_cap=4096, min_steps=2, vmem_limit=40 * 1024 * 1024),
}


def _tpu_generation():
    try:
        kind = jax.devices()[0].device_kind.lower()
    except Exception:
        return "default"
    for g in ("v7", "v6", "v5"):
        if g in kind:
            return g
    if "tpu7" in kind or "7x" in kind:
        return "v7"
    return "default"


def _pick_f_tile(BT, m, rows_cap, min_steps):
    """Largest multiple-of-8 frame tile dividing BT with f_tile*m <= rows_cap and at
    least `min_steps` grid steps (2 on v7x for its two TCs, 1 on single-TC v5e/v6e)."""
    cap_frames = max(1, rows_cap // max(m, 1))
    best = None
    for f in range(8, BT + 1, 8):
        if BT % f == 0 and f <= cap_frames and (BT // f) >= min_steps:
            best = f
    # Fallback: the whole array as one block (always a legal BlockSpec).
    return best if best is not None else BT


def _pick_chunk_frames(f_tile, m, target_rows):
    """Largest multiple-of-8 frame chunk dividing f_tile with chunk*m <= target_rows
    (bounds live intermediates so the (rows,512) activation never fully materializes)."""
    cap = max(1, target_rows // max(m, 1))
    if f_tile <= cap:
        return f_tile
    best = None
    for c in range(8, min(cap, f_tile) + 1, 8):
        if f_tile % c == 0:
            best = c
    return best if best is not None else f_tile


def _sample_indices(N, M):
    """h_samp = torch.arange(0, N, N/M); .float().long() truncates -> floor(k*N/M)."""
    step = float(N) / float(M)
    return [min(int(k * step), N - 1) for k in range(M)]


# ----------------------------------------------------------------------------- wrapper
def sampler_net_forward(X, params, num_point, f_tile=None, chunk_rows_target=1024):
    """X: (B, T, N, 3) float32.  Returns (y: (B*T, M, 3), feats: (B, T, 512))."""
    B, T, N, C = X.shape
    assert C == 3
    BT = B * T
    M = int(num_point)
    w1, b1, w2, b2, w3, b3 = params
    F = w3.shape[1]

    cfg = _GEN_CFG.get(_tpu_generation(), _GEN_CFG["default"])

    Xf = X.reshape(BT, N, 3).astype(jnp.float32)

    # ---- deterministic sub-sampling: h_samp is a construction-time constant, so the
    # gather is baked as a static strided slice (or constant-index take) - no dynamic
    # gather, no runtime clip.  Identical indices for every frame.
    idx = _sample_indices(N, M)
    stride = (idx[1] - idx[0]) if M > 1 else 1
    if M > 1 and stride > 0 and idx == list(range(0, stride * M, stride)):
        y = jax.lax.slice(Xf, (0, 0, 0), (BT, idx[-1] + 1, 3), (1, stride, 1))
    else:
        y = jnp.take(Xf, jnp.asarray(np.asarray(idx, dtype=np.int32)), axis=1)
    # y: (BT, M, 3) -- the module's first output.

    # ---- pad M to a multiple of 8 by duplicating point 0 (max-pool invariant), so the
    # in-kernel pool stays an aligned sublane reduction.
    M_pad = ((M + 7) // 8) * 8
    if M_pad != M:
        pad = jnp.broadcast_to(y[:, :1, :], (BT, M_pad - M, 3))
        y_k = jnp.concatenate([y, pad], axis=1)
    else:
        y_k = y

    # ---- pad coordinates 3 -> 8 (and w1 to (8,64)) so layer 1 is one aligned matmul.
    rows = y_k.reshape(BT * M_pad, 3)
    rows8 = jnp.pad(rows, ((0, 0), (0, 8 - rows.shape[1])))
    w1p = jnp.pad(w1.astype(jnp.float32), ((0, 8 - w1.shape[0]), (0, 0)))

    if f_tile is None:
        f_tile = _pick_f_tile(BT, M_pad, cfg["rows_cap"], cfg["min_steps"])
    assert BT % f_tile == 0
    grid = (BT // f_tile,)
    chunk_frames = _pick_chunk_frames(f_tile, M_pad, chunk_rows_target)

    # MXU operands in bf16 (f32 accumulation inside the kernel); biases in f32.
    w2b = w2.astype(jnp.bfloat16)
    w3b = w3.astype(jnp.bfloat16)
    b1f = b1.reshape(1, -1).astype(jnp.float32)
    b2f = b2.reshape(1, -1).astype(jnp.float32)
    b3f = b3.reshape(1, -1).astype(jnp.float32)

    kernel = functools.partial(_pointnet_feature_kernel, m=M_pad,
                               chunk_frames=chunk_frames)
    const2d = lambda i: (0, 0)                      # grid-invariant weight blocks

    feats = pl.pallas_call(
        kernel,
        out_shape=jax.ShapeDtypeStruct((BT, F), jnp.float32),
        grid_spec=pltpu.PrefetchScalarGridSpec(
            num_scalar_prefetch=0,
            grid=grid,
            in_specs=[
                pl.BlockSpec((f_tile * M_pad, 8), lambda i: (i, 0)),   # sampled points
                pl.BlockSpec(w1p.shape, const2d),
                pl.BlockSpec(b1f.shape, const2d),
                pl.BlockSpec(w2b.shape, const2d),
                pl.BlockSpec(b2f.shape, const2d),
                pl.BlockSpec(w3b.shape, const2d),
                pl.BlockSpec(b3f.shape, const2d),
            ],
            out_specs=pl.BlockSpec((f_tile, F), lambda i: (i, 0)),     # lane-dense feats
        ),
        compiler_params=pltpu.CompilerParams(
            dimension_semantics=("parallel",),
            vmem_limit_bytes=cfg["vmem_limit"]),
    )(rows8, w1p, b1f, w2b, b2f, w3b, b3f)

    return y, feats.reshape(B, T, F)


# ----------------------------------------------------------------------------- reference
def _reference(X, params, num_point):
    """Plain-JAX (f32) reference for verification."""
    B, T, N, _ = X.shape
    M = int(num_point)
    w1, b1, w2, b2, w3, b3 = params
    idx = jnp.asarray(np.asarray(_sample_indices(N, M), dtype=np.int32))
    y = jnp.take(X.reshape(B * T, N, 3), idx, axis=1)
    h = jnp.maximum(y @ w1 + b1, 0.0)
    h = jnp.maximum(h @ w2 + b2, 0.0)
    h = jnp.maximum(h @ w3 + b3, 0.0)
    feats = jnp.max(h, axis=1).reshape(B, T, -1)
    return y, feats


if __name__ == "__main__":
    # Module constructor args implied: MAX_NUM_POINTS = N = 16, NUM_POINT = M = 8,
    # n_frames = T = 8; batch B = 2  (BT = 16 frames, 128 sampled points total).
    B, T, N, M = 2, 8, 16, 8

    key = jax.random.PRNGKey(0)
    kx, k1, k2, k3, kb1, kb2, kb3 = jax.random.split(key, 7)

    X = jax.random.normal(kx, (B, T, N, 3), dtype=jnp.float32)

    # Deterministic synthetic PointNet-feature weights (3 -> 64 -> 128 -> 512).
    params = (
        0.1 * jax.random.normal(k1, (3, 64), dtype=jnp.float32),
        0.1 * jax.random.normal(kb1, (1, 64), dtype=jnp.float32),
        0.1 * jax.random.normal(k2, (64, 128), dtype=jnp.float32),
        0.1 * jax.random.normal(kb2, (1, 128), dtype=jnp.float32),
        0.1 * jax.random.normal(k3, (128, 512), dtype=jnp.float32),
        0.1 * jax.random.normal(kb3, (1, 512), dtype=jnp.float32),
    )

    y, feats = sampler_net_forward(X, params, M)
    jax.block_until_ready((y, feats))

    y_ref, feats_ref = _reference(X, params, M)
    assert y.shape == (B * T, M, 3) and feats.shape == (B, T, 512)
    assert jnp.allclose(y, y_ref, atol=1e-6), "sampled points mismatch"
    # bf16 MXU operands (f32 accumulation) vs f32 reference -> modest tolerance.
    assert jnp.allclose(feats, feats_ref, atol=2e-2, rtol=2e-2), "features mismatch"

    print("KERNEL_OK")
</pallas_src>

<mosaic_0001>
module attributes {stable_mosaic.version = 11 : i64} {
  func.func @_pointnet_feature_kernel(%arg0: i32, %arg1: memref<64x8xf32, #tpu.memory_space<vmem>>, %arg2: memref<8x64xf32, #tpu.memory_space<vmem>>, %arg3: memref<1x64xf32, #tpu.memory_space<vmem>>, %arg4: memref<64x128xbf16, #tpu.memory_space<vmem>>, %arg5: memref<1x128xf32, #tpu.memory_space<vmem>>, %arg6: memref<128x512xbf16, #tpu.memory_space<vmem>>, %arg7: memref<1x512xf32, #tpu.memory_space<vmem>>, %arg8: memref<8x512xf32, #tpu.memory_space<vmem>>) attributes {dimension_semantics = [#tpu.dimension_semantics<parallel>], iteration_bounds = array<i64: 2>, scalar_prefetch = 0 : i64, scratch_operands = 0 : i64, tpu.core_type = #tpu.core_type<tc>, window_params = [{transform_indices = @transform_0, window_bounds = array<i64: 64, 8>}, {pipeline_mode = #tpu.pipeline_mode<synchronous>, transform_indices = @transform_1, window_bounds = array<i64: 8, 64>}, {pipeline_mode = #tpu.pipeline_mode<synchronous>, transform_indices = @transform_2, window_bounds = array<i64: 1, 64>}, {pipeline_mode = #tpu.pipeline_mode<synchronous>, transform_indices = @transform_3, window_bounds = array<i64: 64, 128>}, {pipeline_mode = #tpu.pipeline_mode<synchronous>, transform_indices = @transform_4, window_bounds = array<i64: 1, 128>}, {pipeline_mode = #tpu.pipeline_mode<synchronous>, transform_indices = @transform_5, window_bounds = array<i64: 128, 512>}, {pipeline_mode = #tpu.pipeline_mode<synchronous>, transform_indices = @transform_6, window_bounds = array<i64: 1, 512>}, {transform_indices = @transform_7, window_bounds = array<i64: 8, 512>}]} {
    %c0 = arith.constant 0 : index
    %c0_0 = arith.constant 0 : index
    %0 = vector.load %arg2[%c0, %c0_0] : memref<8x64xf32, #tpu.memory_space<vmem>>, vector<8x64xf32>
    %c0_1 = arith.constant 0 : index
    %c0_2 = arith.constant 0 : index
    %1 = vector.load %arg3[%c0_1, %c0_2] : memref<1x64xf32, #tpu.memory_space<vmem>>, vector<1x64xf32>
    %c0_3 = arith.constant 0 : index
    %c0_4 = arith.constant 0 : index
    %2 = vector.load %arg4[%c0_3, %c0_4] : memref<64x128xbf16, #tpu.memory_space<vmem>>, vector<64x128xbf16>
    %c0_5 = arith.constant 0 : index
    %c0_6 = arith.constant 0 : index
    %3 = vector.load %arg5[%c0_5, %c0_6] : memref<1x128xf32, #tpu.memory_space<vmem>>, vector<1x128xf32>
    %c0_7 = arith.constant 0 : index
    %c0_8 = arith.constant 0 : index
    %4 = vector.load %arg6[%c0_7, %c0_8] : memref<128x512xbf16, #tpu.memory_space<vmem>>, vector<128x512xbf16>
    %c0_9 = arith.constant 0 : index
    %c0_10 = arith.constant 0 : index
    %5 = vector.load %arg7[%c0_9, %c0_10] : memref<1x512xf32, #tpu.memory_space<vmem>>, vector<1x512xf32>
    %c0_11 = arith.constant 0 : index
    %c0_12 = arith.constant 0 : index
    %6 = vector.load %arg1[%c0_11, %c0_12] : memref<64x8xf32, #tpu.memory_space<vmem>>, vector<64x8xf32>
    %cst = arith.constant dense<0.000000e+00> : vector<64x64xf32>
    %7 = tpu.matmul %6, %0, %cst {dimension_numbers = #tpu.dot_dimension_numbers<[1], [0], [0], [1], [0, 0, 1, 1], [], []>} : vector<64x8xf32>, vector<8x64xf32>, vector<64x64xf32> -> vector<64x64xf32>
    %8 = vector.broadcast %1 : vector<1x64xf32> to vector<64x64xf32>
    %9 = arith.addf %7, %8 : vector<64x64xf32>
    %cst_13 = arith.constant 0.000000e+00 : f32
    %10 = vector.broadcast %cst_13 : f32 to vector<64x64xf32>
    %11 = arith.maximumf %9, %10 : vector<64x64xf32>
    %12 = arith.truncf %11 : vector<64x64xf32> to vector<64x64xbf16>
    %cst_14 = arith.constant dense<0.000000e+00> : vector<64x128xf32>
    %13 = tpu.matmul %12, %2, %cst_14 {dimension_numbers = #tpu.dot_dimension_numbers<[1], [0], [0], [1], [0, 0, 1, 1], [], []>} : vector<64x64xbf16>, vector<64x128xbf16>, vector<64x128xf32> -> vector<64x128xf32>
    %14 = vector.broadcast %3 : vector<1x128xf32> to vector<64x128xf32>
    %15 = arith.addf %13, %14 : vector<64x128xf32>
    %cst_15 = arith.constant 0.000000e+00 : f32
    %16 = vector.broadcast %cst_15 : f32 to vector<64x128xf32>
    %17 = arith.maximumf %15, %16 : vector<64x128xf32>
    %18 = arith.truncf %17 : vector<64x128xf32> to vector<64x128xbf16>
    %cst_16 = arith.constant dense<0.000000e+00> : vector<64x512xf32>
    %19 = tpu.matmul %18, %4, %cst_16 {dimension_numbers = #tpu.dot_dimension_numbers<[1], [0], [0], [1], [0, 0, 1, 1], [], []>} : vector<64x128xbf16>, vector<128x512xbf16>, vector<64x512xf32> -> vector<64x512xf32>
    %20 = vector.broadcast %5 : vector<1x512xf32> to vector<64x512xf32>
    %21 = arith.addf %19, %20 : vector<64x512xf32>
    %cst_17 = arith.constant 0.000000e+00 : f32
    %22 = vector.broadcast %cst_17 : f32 to vector<64x512xf32>
    %23 = arith.maximumf %21, %22 : vector<64x512xf32>
    %24 = vector.shape_cast %23 : vector<64x512xf32> to vector<8x8x512xf32>
    %cst_18 = arith.constant dense<0xFF800000> : vector<8x512xf32>
    %25 = vector.multi_reduction <maximumf>, %24, %cst_18 [1] : vector<8x8x512xf32> to vector<8x512xf32>
    %c0_19 = arith.constant 0 : index
    %c0_20 = arith.constant 0 : index
    %26 = vector.load %arg8[%c0_19, %c0_20] : memref<8x512xf32, #tpu.memory_space<vmem>>, vector<8x512xf32>
    tpu.vector_store %arg8[%c0_19, %c0_20], %25 {strides = array<i32>} : memref<8x512xf32, #tpu.memory_space<vmem>>, vector<8x512xf32>,
    return
  }
  func.func @transform_0(%arg0: i32) -> (i32, i32) {
    %c0_i32 = arith.constant 0 : i32
    %c0_i32_0 = arith.constant 0 : i32
    return %arg0, %c0_i32 : i32, i32
  }
  func.func @transform_1(%arg0: i32) -> (i32, i32) {
    %c0_i32 = arith.constant 0 : i32
    %c0_i32_0 = arith.constant 0 : i32
    %c0_i32_1 = arith.constant 0 : i32
    return %c0_i32, %c0_i32_0 : i32, i32
  }
  func.func @transform_2(%arg0: i32) -> (i32, i32) {
    %c0_i32 = arith.constant 0 : i32
    %c0_i32_0 = arith.constant 0 : i32
    %c0_i32_1 = arith.constant 0 : i32
    return %c0_i32, %c0_i32_0 : i32, i32
  }
  func.func @transform_3(%arg0: i32) -> (i32, i32) {
    %c0_i32 = arith.constant 0 : i32
    %c0_i32_0 = arith.constant 0 : i32
    %c0_i32_1 = arith.constant 0 : i32
    return %c0_i32, %c0_i32_0 : i32, i32
  }
  func.func @transform_4(%arg0: i32) -> (i32, i32) {
    %c0_i32 = arith.constant 0 : i32
    %c0_i32_0 = arith.constant 0 : i32
    %c0_i32_1 = arith.constant 0 : i32
    return %c0_i32, %c0_i32_0 : i32, i32
  }
  func.func @transform_5(%arg0: i32) -> (i32, i32) {
    %c0_i32 = arith.constant 0 : i32
    %c0_i32_0 = arith.constant 0 : i32
    %c0_i32_1 = arith.constant 0 : i32
    return %c0_i32, %c0_i32_0 : i32, i32
  }
  func.func @transform_6(%arg0: i32) -> (i32, i32) {
    %c0_i32 = arith.constant 0 : i32
    %c0_i32_0 = arith.constant 0 : i32
    %c0_i32_1 = arith.constant 0 : i32
    return %c0_i32, %c0_i32_0 : i32, i32
  }
  func.func @transform_7(%arg0: i32) -> (i32, i32) {
    %c0_i32 = arith.constant 0 : i32
    %c0_i32_0 = arith.constant 0 : i32
    return %arg0, %c0_i32 : i32, i32
  }
}

</mosaic_0001>

<bundles_post_ra>
// kernel: tpu_custom_call.1
= control target key start
LH: loop header
LB: loop body
LE: loop exit
PB: predicated region body
PF: predicated region fallthrough
CT: control target
= control target key end

     0   :  { %12 = vsyncpa [#allocation3], 0  ;;  %s1987_s0 = inlined_call_operand.vmem [shape: f32[128,8], index: 0, kind: input, shape index: {}]   ;;  %s1988_s1 = inlined_call_operand.vmem [shape: f32[8,64], index: 1, kind: input, shape index: {}]   ;;  %s1989_s2 = inlined_call_operand.vmem [shape: f32[1,64], index: 2, kind: input, shape index: {}]   ;;  %s1990_s3 = inlined_call_operand.vmem [shape: bf16[64,128], index: 3, kind: input, shape index: {}]   ;;  %s1991_s4 = inlined_call_operand.vmem [shape: f32[1,128], index: 4, kind: input, shape index: {}]   ;;  %s1992_s5 = inlined_call_operand.hbm [shape: bf16[128,512], index: 5, kind: input, shape index: {}]   ;;  %s1993_s6 = inlined_call_operand.vmem [shape: f32[1,512], index: 6, kind: input, shape index: {}]   ;;  %s1994_s7 = inlined_call_operand.hbm [shape: f32[16,512], index: 7, kind: output, shape index: {}]  }
   0x1   :  { %13 = vsyncpa [#allocation4], 0 }
   0x2   :  { %15 = vsyncpa [#allocation4 + $0x1], 0  ;;  %s1685_s24 = smov 0   ;;  %s1687_s25 = smov 0  }
   0x3   :  { %s1689_s26 = smov 0   ;;  %s1691_s27 = smov 0  }
   0x4 LB: > { %s1706_s28 = sadd.s32 4294967295, %s1638_s27   ;;  %s1327_s29 = sadd.s32 4294967294, %s1638_s27   ;;  %s1638_s27 = sphi %s1691_s27, %s2010_s27   ;;  %s1634_s26 = sphi %s1689_s26, %s2009_s26   ;;  %s1630_s25 = sphi %s1687_s25, %s2008_s25   ;;  %s1626_s24 = sphi %s1685_s24, %s2007_s24  }
   0x5   : > { %s1710_s30 = sadd.s32 1, %s1638_s27   ;;  %s180_s8 = sadd.s32 1, %s1634_s26 }
   0x6   : > { %s177_s9 = ssub.s32 %s1638_s27, %s1710_s30  ;;  %p190_p0 = scmp.ne.s32.totalorder %s1634_s26, %s1630_s25 }
   0x7   : > { %p178_p1 = scmp.eq.s32.totalorder %s177_s9, 0  ;;  %p191_p2 = scmp.eq.s32.totalorder %s1706_s28, 1 }
   0x8   : > { %p196_p3 = scmp.ne.s32.totalorder %s1630_s25, %s1626_s24  ;;  %p197_p4 = scmp.eq.s32.totalorder %s1327_s29, 1 }
   0x9   : > { %s1721_s10 = scalar_select %p178_p1, %s1634_s26, %s180_s8  }
   0xa   : > { %p1723_p5 = por %p191_p2, %p190_p0  ;;  %p1727_p6 = por %p197_p4, %p196_p3 }
   0xb   : > { %p1328_p7 = scmp.ge.s32.totalorder %s1638_s27, 1  ;;  %p204_p8 = scmp.lt.s32.totalorder %s1638_s27, 3 }
   0xc   : > { %s1998_s11 = scalar_select %p1723_p5, 1, 0 }
   0xd   : > { %s1999_s12 = scalar_select %p1727_p6, 1, 0 }
   0xe   : > { %p1995_p9 = scmp.eq.s32.totalorder %s1706_s28, 0  ;;  %p1734_p10 = pnand %p1328_p7, %p204_p8 }
   0xf   : > { %s1640_s14 = smov [#allocation2]   ;;  %s1544_s19 = scalar_lea.hbm %s1992_s5, 4096 }
  0x10   : > { %s2000_s13 = scalar_select %p1734_p10, 1, 0 }
  0x11   : > { %s228_s15 = sshll.u32 %s1640_s14, 4  ;;  %p1445_p11 = pneg %p1734_p10  ;;  %s229_s15 = int_to_ptr.vmem [resolvable:$true] %s228_s15 }
  0x12   : > { %p1545_p13 = scmp.ne.s32.totalorder %s1992_s5, %s1544_s19  ;;  %p1551_p3 = scmp.lt.u32.totalorder %s1544_s19, %s1992_s5 }
  0x13   : > { %p1742_p12 = pnand %p1995_p9, %p1445_p11 }
  0x15   : > { %p1546_p0 = pneg %p1742_p12 }
  0x17   : > { %p1547_p1 = pnand %p1546_p0, %p1545_p13 }
  0x19   : > { %p1548_p2 = pneg %p1547_p1 }
  0x1b   : > { %p1553_p4 = pnand %p1551_p3, %p1548_p2 }
  0x1d   : > { %1556 = shalt.err (!%p1553_p4)
}
  0x1e   : > { %s1557_s29 = scalar_lea.vmem %s229_s15, 4096  ;;  %p1565_p9 = scmp.lt.s32.totalorder %s229_s15, %s229_s15 }
  0x1f   : > { %p1558_p7 = scmp.ne.s32.totalorder %s229_s15, %s1557_s29  ;;  %p1566_p6 = scmp.lt.s32.totalorder %s1557_s29, %s1557_s29 }
  0x21   : > { %p1560_p8 = pnand %p1558_p7, %p1546_p0  ;;  %p1567_p5 = por %p1566_p6, %p1565_p9 }
  0x23   : > { %p1561_p11 = pneg %p1560_p8 }
  0x25   : > { %p1568_p10 = pnand %p1567_p5, %p1561_p11 }
  0x27   : > { %1571 = shalt.err (!%p1568_p10)
}
  0x28   : > { %s1641_s8 = smov 256   ;;  %s1642_s9 = smov 16  }
  0x29   : > { %1448 = dma.hbm_to_vmem [thread:$0]  (!%p1742_p12), %s1992_s5, 4096, %s229_s15, [#allocation3], %s1641_s8, %s1641_s8, %s1642_s9  }
  0x2a   : > { %p2002_p13 = scmp.ne.s32.totalorder %s2000_s13, 0 }
  0x2b   : > { %p2003_p1 = scmp.eq.s32.totalorder (!%p2002_p13), %s1706_s28, 0 }
  0x2c   : > { %256 = sbr.rel (%p2002_p13) target bundleno = 804 (0x324), region = 48 }
  0x33   : > { %1617 = dma.done.wait (%p2003_p1), [#allocation3], 4096   ;;  %p2004_p0 = pmov %p2003_p1 }
  0x34   : > { %s1334_s18 = sshll.u32 %s1706_s28, 3  ;;  %vm353_vm0 = vcmask 64512   ;;  %v295_v0 = vld [vmem:[%s1988_s1] sm:$0xff]  ;;  %v1493_v10 = vld [vmem:[%s1990_s3 + $0x8] sm:$0xff]   ;;  %v1494_v11 = vld [vmem:[%s1990_s3 + $0x10] sm:$0xff]   ;;  %vm525_vm1 = vcmask 523264  }
  0x35   : > { %1619 = vsyncadd (%p2004_p0), [#allocation3], 4294963200  ;;  %p289_p5 = scmp.lt.s32.totalorder %s1334_s18, 15  ;;  %1409 = vmatprep.subr.mxu0 %v295_v0  ;;  %v1492_v6 = vld [vmem:[%s1990_s3] sm:$0xff]   ;;  %v1495_v12 = vld [vmem:[%s1990_s3 + $0x18] sm:$0xff]   ;;  %vm1198_vm2 = vcmask 1041409  }
  0x36   : > { %1410 = vmatpush3.msra.mxu0 %v295_v0  ;;  %1423 = vmatprep.subr.bf16.mxu1 %v1492_v6  ;;  %v1496_v13 = vld [vmem:[#allocation2] ss:$16 sps:$4 sm:$0xff]   ;;  %v1498_v14 = vld [vmem:[#allocation2 + $0x4] ss:$16 sps:$4 sm:$0xff]   ;;  %v1501_v15 = vld [vmem:[#allocation2 + $0xc] ss:$16 sps:$4 sm:$0xff]  }
  0x37   : > { %s2012_s18 = smov (!%p289_p5, %s1334_s18), 15  ;;  %1424 = vmatpush3.bf16.msra.mxu1 %v1492_v6  ;;  %v1504_v16 = vld [vmem:[#allocation2 + $0x24] ss:$16 sps:$4 sm:$0xff]   ;;  %796 = vmatprep.subr.bf16.mxu0 %v1498_v14  ;;  %v1502_v17 = vld [vmem:[#allocation2 + $0x20] ss:$16 sps:$4 sm:$0xff]   ;;  %vm1200_vm3 = vcmask 1042434  }
  0x38   : > { %s1335_s19 = sshll.u32 %s2012_s18, 3  ;;  %1425 = vmatprep.subr.bf16.mxu1 %v1493_v10  ;;  %v1510_v18 = vld [vmem:[#allocation2 + $0x44] ss:$16 sps:$4 sm:$0xff]   ;;  %v1508_v19 = vld [vmem:[#allocation2 + $0x40] ss:$16 sps:$4 sm:$0xff]   ;;  %vm1202_vm4 = vcmask 1043459  }
  0x39   : > { %s292_s21 = scalar_lea.vmem %s1987_s0, %s1335_s19  ;;  %v1516_v20 = vld [vmem:[#allocation2 + $0x64] ss:$16 sps:$4 sm:$0xff]   ;;  %v1514_v21 = vld [vmem:[#allocation2 + $0x60] ss:$16 sps:$4 sm:$0xff]   ;;  %v1499_v43 = vld [vmem:[#allocation2 + $0x8] ss:$16 sps:$4 sm:$0xff]  }
  0x3a   : > { %v339_v1 = vld [vmem:[%s292_s21] sm:$0xff]  ;;  %v340_v2 = vld [vmem:[%s292_s21 + $0x8] sm:$0xff]  ;;  %v341_v3 = vld [vmem:[%s292_s21 + $0x10] sm:$0xff]  ;;  %vm1204_vm5 = vcmask 1044484   ;;  %vm1206_vm6 = vcmask 1045509   ;;  %vm1208_vm7 = vcmask 1046534  }
  0x3b   : > { %1411 = vmatprep.mubr.msk.f32.mxu0 %vm353_vm0, %v339_v1  ;;  %v342_v4 = vld [vmem:[%s292_s21 + $0x18] sm:$0xff]  ;;  %v343_v5 = vld [vmem:[%s292_s21 + $0x20] sm:$0xff]  ;;  %v344_v7 = vld [vmem:[%s292_s21 + $0x28] sm:$0xff]  ;;  %1426 = vmatpush3.bf16.msra.mxu1 %v1493_v10  ;;  %v1643_v10 = vmov 0   ;;  %s285_s13 = sand.u32 1, %s1630_s25   ;;  %vm1210_vm8 = vcmask 1047559  }
  0x3c   : > { %1412 = vmatmul.mubr.msk.f32.vlgmr.msra.gmra.mrb[0].mxu0 %vm353_vm0, %v340_v2  ;;  %v345_v8 = vld [vmem:[%s292_s21 + $0x30] sm:$0xff]  ;;  %v346_v9 = vld [vmem:[%s292_s21 + $0x38] sm:$0xff]  ;;  %1427 = vmatprep.subr.bf16.mxu1 %v1494_v11  ;;  %v1336_v26 = vld [vmem:[%s1989_s2] ss:$0 sm:$0xff]  ;;  %s1333_s23 = sshll.u32 %s285_s13, 5  ;;  %s1391_s29 = sshll.u32 %s1706_s28, 9 }
  0x3d   : > { %1414 = vmatprep.mubr.msk.f32.mxu0 %vm353_vm0, %v341_v3  ;;  %797 = vmatpush1.bf16.msra.mxu0 %v1496_v13  ;;  %v1522_v22 = vld [vmem:[#allocation2 + $0x84] ss:$16 sps:$4 sm:$0xff]   ;;  %v1520_v23 = vld [vmem:[#allocation2 + $0x80] ss:$16 sps:$4 sm:$0xff]   ;;  %v1507_v46 = vld [vmem:[#allocation2 + $0x2c] ss:$16 sps:$4 sm:$0xff]   ;;  %s1941_s18 = scalar_lea.hbm %s1994_s7, %s1391_s29 }
  0x3e   : > { %798 = vmatprep.subr.bf16.mxu0 %v1504_v16  ;;  %v1528_v24 = vld [vmem:[#allocation2 + $0xa4] ss:$16 sps:$4 sm:$0xff]   ;;  %v1526_v25 = vld [vmem:[#allocation2 + $0xa0] ss:$16 sps:$4 sm:$0xff]   ;;  %v1505_v52 = vld [vmem:[#allocation2 + $0x28] ss:$16 sps:$4 sm:$0xff]  }
  0x3f   : > { %1428 = vmatpush3.bf16.msra.mxu1 %v1494_v11  ;;  %v1513_v55 = vld [vmem:[#allocation2 + $0x4c] ss:$16 sps:$4 sm:$0xff]   ;;  %v1511_v58 = vld [vmem:[#allocation2 + $0x48] ss:$16 sps:$4 sm:$0xff]   ;;  %v1534_v2 = vld [vmem:[#allocation2 + $0xc4] ss:$16 sps:$4 sm:$0xff]  }
  0x40   : > { %1415 = vmatmul.mubr.msk.f32.gmra.mrb[2].mxu0 %vm353_vm0, %v342_v4  ;;  %1429 = vmatprep.subr.bf16.mxu1 %v1495_v12  ;;  %v1519_v60 = vld [vmem:[#allocation2 + $0x6c] ss:$16 sps:$4 sm:$0xff]   ;;  %v1517_v61 = vld [vmem:[#allocation2 + $0x68] ss:$16 sps:$4 sm:$0xff]   ;;  %v1532_v4 = vld [vmem:[#allocation2 + $0xc0] ss:$16 sps:$4 sm:$0xff]  }
  0x41   : > { %1417 = vmatprep.mubr.msk.f32.mxu0 %vm353_vm0, %v343_v5  ;;  %799 = vmatpush1.bf16.msra.mxu0 %v1502_v17  ;;  %v1525_v62 = vld [vmem:[#allocation2 + $0x8c] ss:$16 sps:$4 sm:$0xff]   ;;  %v1523_v63 = vld [vmem:[#allocation2 + $0x88] ss:$16 sps:$4 sm:$0xff]   ;;  %v1540_v6 = vld [vmem:[#allocation2 + $0xe4] ss:$16 sps:$4 sm:$0xff]  }
  0x42   : > { %800 = vmatprep.subr.bf16.mxu0 %v1510_v18  ;;  %v1531_v0 = vld [vmem:[#allocation2 + $0xac] ss:$16 sps:$4 sm:$0xff]   ;;  %v1529_v1 = vld [vmem:[#allocation2 + $0xa8] ss:$16 sps:$4 sm:$0xff]   ;;  %v1345_v11 = vld [vmem:[%s1991_s4] ss:$0 sm:$0xff] }
  0x43   : > { %1430 = vmatpush3.bf16.msra.mxu1 %v1495_v12  ;;  %v1537_v3 = vld [vmem:[#allocation2 + $0xcc] ss:$16 sps:$4 sm:$0xff]   ;;  %v1535_v5 = vld [vmem:[#allocation2 + $0xc8] ss:$16 sps:$4 sm:$0xff]   ;;  %s287_s8 = scalar_lea.vmem [#allocation5], %s1333_s23  ;;  %s1242_s28 = scalar_lea.sflag [#allocation4], %s285_s13 }
  0x44   : > { %1418 = vmatmul.mubr.msk.f32.gmra.mrb[4].mxu0 %vm353_vm0, %v344_v7  ;;  %869 = vmatprep.subr.bf16.mxu1 %v1501_v15  ;;  %v1543_v7 = vld [vmem:[#allocation2 + $0xec] ss:$16 sps:$4 sm:$0xff]   ;;  %s1256_s9 = sshll.u32 %s287_s8, 4  ;;  %p2005_p9 = scmp.ne.s32.totalorder %s1998_s11, 0  ;;  %s1943_s9 = int_to_ptr.vmem [resolvable:$true] %s1256_s9 }
  0x45   : > { %1420 = vmatprep.mubr.msk.f32.mxu0 %vm353_vm0, %v345_v8  ;;  %801 = vmatpush1.bf16.msra.mxu0 %v1508_v19  ;;  %v1538_v8 = vld [vmem:[#allocation2 + $0xe0] ss:$16 sps:$4 sm:$0xff]   ;;  %s1572_s19 = scalar_lea.vmem %s1943_s9, 512  ;;  %s1644_s16 = smov [#allocation5]  }
  0x46   : > { %802 = vmatprep.subr.bf16.mxu0 %v1516_v20  ;;  %p1573_p6 = scmp.ne.s32.totalorder %s1943_s9, %s1572_s19  ;;  %s1576_s20 = sshll.u32 %s1644_s16, 4  ;;  %s1577_s20 = int_to_ptr.vmem [resolvable:$false] %s1576_s20 }
  0x47   : > { %s1578_s21 = scalar_lea.vmem %s1577_s20, 1024  ;;  %p1579_p2 = scmp.lt.s32.totalorder %s1943_s9, %s1577_s20 }
  0x48   : > { %1421 = vmatmul.mubr.msk.f32.gmra.mrb[6].mxu0 %vm353_vm0, %v346_v9  ;;  %v1541_v9 = vld [vmem:[#allocation2 + $0xe8] ss:$16 sps:$4 sm:$0xff]   ;;  %p1574_p10 = pnand %p1573_p6, %p2005_p9  ;;  %p1580_p3 = scmp.lt.s32.totalorder %s1578_s21, %s1572_s19 }
  0x49   : > { %803 = vmatpush1.bf16.msra.mxu0 %v1514_v21  ;;  %828 = vmatprep.mubr.bf16.mxu0 %v1643_v10 }
  0x4a   : > { %804 = vmatprep.subr.bf16.mxu0 %v1522_v22  ;;  %p1575_p12 = pneg %p1574_p10  ;;  %p1581_p4 = por %p1580_p3, %p1579_p2 }
  0x4c   : > { %p1582_p7 = pnand %p1581_p4, %p1575_p12 }
  0x4d   : > { %805 = vmatpush1.bf16.msra.mxu0 %v1520_v23 }
  0x4e   : > { %806 = vmatprep.subr.bf16.mxu0 %v1528_v24 }
  0x51   : > { %807 = vmatpush1.bf16.msra.mxu0 %v1526_v25 }
  0x52   : > { %808 = vmatprep.subr.bf16.mxu0 %v1534_v2 }
  0x55   : > { %809 = vmatpush1.bf16.msra.mxu0 %v1532_v4 }
  0x56   : > { %810 = vmatprep.subr.bf16.mxu0 %v1540_v6 }
  0x59   : > { %811 = vmatpush1.bf16.msra.mxu0 %v1538_v8 }
 0x10f   : > { %v1413_v27 = vpop.f32.mrb[0].mxu0 }
 0x110   : > { %v450_v28 = vadd.f32 %v1413_v27, %v1336_v26  ;;  %v444_v29 = vpop.f32.mrb[1].mxu0 }
 0x111   : > { %v445_v30 = vadd.f32 %v1336_v26, %v444_v29 }
 0x112   : > { %v484_v31 = vmax.f32 %v450_v28, 0.0 }
 0x113   : > { %v483_v32 = vmax.f32 %v445_v30, 0.0  ;;  %v1416_v33 = vpop.f32.mrb[2].mxu0 }
 0x114   : > { %v460_v34 = vadd.f32 %v1416_v33, %v1336_v26  ;;  %v454_v35 = vpop.f32.mrb[3].mxu0 }
 0x115   : > { %v455_v36 = vadd.f32 %v1336_v26, %v454_v35  ;;  %v491_v37 = vpack.c.bf16 %v484_v31, %v483_v32 }
 0x116   : > { %v486_v38 = vmax.f32 %v460_v34, 0.0 }
 0x117   : > { %v485_v39 = vmax.f32 %v455_v36, 0.0  ;;  %1431 = vmatprep.mubr.msk.bf16.mxu1 %vm525_vm1, %v491_v37  ;;  %v1419_v40 = vpop.f32.mrb[4].mxu0 }
 0x118   : > { %v470_v41 = vadd.f32 %v1419_v40, %v1336_v26  ;;  %v464_v42 = vpop.f32.mrb[5].mxu0  ;;  %v616_v40 = vlaneseq }
 0x119   : > { %v492_v44 = vpack.c.bf16 %v486_v38, %v485_v39  ;;  %v465_v45 = vadd.f32 %v1336_v26, %v464_v42 }
 0x11a   : > { %v488_v47 = vmax.f32 %v470_v41, 0.0  ;;  %v617_v41 = vshrl.u32 %v616_v40, 7 }
 0x11b   : > { %1432 = vmatmul.mubr.msk.bf16.vlgmr.msra.gmra.mrb[0].mxu1 %vm525_vm1, %v492_v44  ;;  %v487_v48 = vmax.f32 %v465_v45, 0.0  ;;  %v1422_v49 = vpop.f32.mrb[6].mxu0  ;;  %v338_v44 = vld [vmem:[%s1993_s6] sm:$0xf] }
 0x11c   : > { %v480_v50 = vadd.f32 %v1422_v49, %v1336_v26  ;;  %v474_v51 = vpop.f32.mrb[7].mxu0  ;;  %870 = vmatpush1.bf16.msra.mxu1 %v1499_v43  ;;  %v618_v42 = vsub.s32 0, %v617_v41  ;;  %v626_v43 = vsub.s32 2, %v617_v41  ;;  %v622_v45 = vsub.s32 1, %v617_v41 }
 0x11d   : > { %v493_v53 = vpack.c.bf16 %v488_v47, %v487_v48  ;;  %v475_v54 = vadd.f32 %v1336_v26, %v474_v51  ;;  %871 = vmatprep.subr.bf16.mxu1 %v1507_v46  ;;  %v630_v46 = vsub.s32 3, %v617_v41 }
 0x11e   : > { %v490_v56 = vmax.f32 %v480_v50, 0.0  ;;  %v1808_v47 = vrot.slane %v338_v44, %v618_v42  ;;  %v1810_v48 = vrot.slane %v338_v44, %v626_v43  ;;  %v1812_v49 = vrot.slane %v338_v44, %v622_v45 }
 0x11f   : > { %v489_v57 = vmax.f32 %v475_v54, 0.0  ;;  %1435 = vmatprep.mubr.msk.bf16.mxu1 %vm525_vm1, %v493_v53  ;;  %v1814_v50 = vrot.slane %v338_v44, %v630_v46 }
 0x120   : > { %872 = vmatpush1.bf16.msra.mxu1 %v1505_v52 }
 0x121   : > { %v494_v59 = vpack.c.bf16 %v490_v56, %v489_v57  ;;  %873 = vmatprep.subr.bf16.mxu1 %v1513_v55 }
 0x123   : > { %1436 = vmatmul.mubr.msk.bf16.gmra.mrb[4].mxu1 %vm525_vm1, %v494_v59 }
 0x124   : > { %874 = vmatpush1.bf16.msra.mxu1 %v1511_v58  ;;  %901 = vmatprep.mubr.bf16.mxu1 %v1643_v10 }
 0x125   : > { %875 = vmatprep.subr.bf16.mxu1 %v1519_v60 }
 0x128   : > { %876 = vmatpush1.bf16.msra.mxu1 %v1517_v61 }
 0x129   : > { %877 = vmatprep.subr.bf16.mxu1 %v1525_v62 }
 0x12c   : > { %878 = vmatpush1.bf16.msra.mxu1 %v1523_v63 }
 0x12d   : > { %879 = vmatprep.subr.bf16.mxu1 %v1531_v0 }
 0x130   : > { %880 = vmatpush1.bf16.msra.mxu1 %v1529_v1 }
 0x131   : > { %881 = vmatprep.subr.bf16.mxu1 %v1537_v3 }
 0x134   : > { %882 = vmatpush1.bf16.msra.mxu1 %v1535_v5 }
 0x135   : > { %883 = vmatprep.subr.bf16.mxu1 %v1543_v7 }
 0x138   : > { %884 = vmatpush1.bf16.msra.mxu1 %v1541_v9 }
 0x1ee   : > { %v1433_v12 = vpop.f32.mrb[0].mxu1 }
 0x1ef   : > { %v581_v13 = vadd.f32 %v1433_v12, %v1345_v11  ;;  %v572_v14 = vpop.f32.mrb[1].mxu1 }
 0x1f0   : > { %v573_v15 = vadd.f32 %v1345_v11, %v572_v14  ;;  %v1434_v16 = vpop.f32.mrb[2].mxu1 }
 0x1f1   : > { %v584_v17 = vadd.f32 %v1434_v16, %v1345_v11  ;;  %v575_v18 = vpop.f32.mrb[3].mxu1  ;;  %v605_v20 = vmax.f32 %v581_v13, 0.0 }
 0x1f2   : > { %v576_v19 = vadd.f32 %v1345_v11, %v575_v18  ;;  %v603_v22 = vmax.f32 %v573_v15, 0.0 }
 0x1f3   : > { %v606_v21 = vmax.f32 %v584_v17, 0.0 }
 0x1f4   : > { %v604_v23 = vmax.f32 %v576_v19, 0.0 }
 0x1f5   : > { %v612_v24 = vpack.c.bf16 %v606_v21, %v605_v20 }
 0x1f6   : > { %v611_v25 = vpack.c.bf16 %v604_v23, %v603_v22  ;;  %v1437_v26 = vpop.f32.mrb[4].mxu1 }
 0x1f7   : > { %v597_v27 = vadd.f32 %v1437_v26, %v1345_v11  ;;  %v588_v28 = vpop.f32.mrb[5].mxu1 }
 0x1f8   : > { %829 = vmatmul.mubr.bf16.vlgmr.msra.gmra.mrb[8].mxu0 %v611_v25  ;;  %902 = vmatmul.mubr.bf16.vlgmr.msra.gmra.mrb[8].mxu1 %v611_v25  ;;  %v589_v29 = vadd.f32 %v1345_v11, %v588_v28  ;;  %v1438_v30 = vpop.f32.mrb[6].mxu1 }
 0x1f9   : > { %v609_v31 = vmax.f32 %v597_v27, 0.0  ;;  %v600_v32 = vadd.f32 %v1438_v30, %v1345_v11  ;;  %v591_v33 = vpop.f32.mrb[7].mxu1  ;;  %838 = vmatprep.mubr.bf16.mxu0 %v1643_v10  ;;  %911 = vmatprep.mubr.bf16.mxu1 %v1643_v10 }
 0x1fa   : > { %v607_v34 = vmax.f32 %v589_v29, 0.0  ;;  %v592_v35 = vadd.f32 %v1345_v11, %v591_v33 }
 0x1fb   : > { %v610_v36 = vmax.f32 %v600_v32, 0.0 }
 0x1fc   : > { %v608_v37 = vmax.f32 %v592_v35, 0.0 }
 0x1fd   : > { %v614_v38 = vpack.c.bf16 %v610_v36, %v609_v31 }
 0x1fe   : > { %v613_v39 = vpack.c.bf16 %v608_v37, %v607_v34 }
 0x200   : > { %839 = vmatmul.mubr.bf16.gmra.mrb[12].mxu0 %v612_v24  ;;  %912 = vmatmul.mubr.bf16.gmra.mrb[12].mxu1 %v612_v24 }
 0x201   : > { %848 = vmatprep.mubr.bf16.mxu0 %v1643_v10  ;;  %921 = vmatprep.mubr.bf16.mxu1 %v1643_v10 }
 0x208   : > { %849 = vmatmul.mubr.bf16.gmra.mrb[16].mxu0 %v613_v39  ;;  %922 = vmatmul.mubr.bf16.gmra.mrb[16].mxu1 %v613_v39 }
 0x209   : > { %858 = vmatprep.mubr.bf16.mxu0 %v1643_v10  ;;  %931 = vmatprep.mubr.bf16.mxu1 %v1643_v10 }
 0x210   : > { %859 = vmatmul.mubr.bf16.gmra.mrb[20].mxu0 %v614_v38  ;;  %932 = vmatmul.mubr.bf16.gmra.mrb[20].mxu1 %v614_v38 }
 0x2cb   : > { %v830_v51 = vpop.f32.mrb[8].mxu0  ;;  %v903_v52 = vpop.f32.mrb[8].mxu1 }
 0x2cc   : > { %v831_v53 = vadd.f32 %v830_v51, %v1808_v47  ;;  %v904_v54 = vadd.f32 %v903_v52, %v1810_v48  ;;  %v832_v55 = vpop.f32.mrb[9].mxu0  ;;  %v905_v56 = vpop.f32.mrb[9].mxu1 }
 0x2cd   : > { %v833_v57 = vadd.f32 %v832_v55, %v1812_v49  ;;  %v906_v58 = vadd.f32 %v905_v56, %v1814_v50  ;;  %v834_v59 = vpop.f32.mrb[10].mxu0  ;;  %v907_v60 = vpop.f32.mrb[10].mxu1 }
 0x2ce   : > { %v942_v61 = vmax.f32 %v831_v53, 0.0  ;;  %v944_v62 = vmax.f32 %v904_v54, 0.0  ;;  %v835_v63 = vadd.f32 %v834_v59, %v1808_v47  ;;  %v908_v0 = vadd.f32 %v907_v60, %v1810_v48  ;;  %v836_v1 = vpop.f32.mrb[11].mxu0  ;;  %v909_v2 = vpop.f32.mrb[11].mxu1 }
 0x2cf   : > { %v943_v3 = vmax.f32 %v833_v57, 0.0  ;;  %v945_v4 = vmax.f32 %v906_v58, 0.0  ;;  %v837_v5 = vadd.f32 %v836_v1, %v1812_v49  ;;  %v910_v6 = vadd.f32 %v909_v2, %v1814_v50 }
 0x2d0   : > { %v974_v7 = vrot.slane %v942_v61, 4  ;;  %v986_v8 = vrot.slane %v944_v62, 4  ;;  %v946_v9 = vmax.f32 %v835_v63, 0.0  ;;  %v948_v10 = vmax.f32 %v908_v0, 0.0 }
 0x2d1   : > { %v980_v11 = vrot.slane %v943_v3, 4  ;;  %v992_v12 = vrot.slane %v945_v4, 4  ;;  %v947_v13 = vmax.f32 %v837_v5, 0.0  ;;  %v949_v14 = vmax.f32 %v910_v6, 0.0 }
 0x2d2   : > { %v975_v15 = vmax.f32 %v942_v61, %v974_v7  ;;  %v987_v16 = vmax.f32 %v944_v62, %v986_v8  ;;  %v998_v17 = vrot.slane %v946_v9, 4  ;;  %v1010_v18 = vrot.slane %v948_v10, 4 }
 0x2d3   : > { %v981_v19 = vmax.f32 %v943_v3, %v980_v11  ;;  %v993_v20 = vmax.f32 %v945_v4, %v992_v12  ;;  %v1004_v21 = vrot.slane %v947_v13, 4  ;;  %v1016_v22 = vrot.slane %v949_v14, 4  ;;  %v840_v23 = vpop.f32.mrb[12].mxu0  ;;  %v913_v24 = vpop.f32.mrb[12].mxu1 }
 0x2d4   : > { %v976_v25 = vrot.slane %v975_v15, 2  ;;  %v988_v26 = vrot.slane %v987_v16, 2  ;;  %v999_v27 = vmax.f32 %v946_v9, %v998_v17  ;;  %v1011_v28 = vmax.f32 %v948_v10, %v1010_v18  ;;  %v842_v29 = vpop.f32.mrb[13].mxu0  ;;  %v915_v30 = vpop.f32.mrb[13].mxu1 }
 0x2d5   : > { %v982_v31 = vrot.slane %v981_v19, 2  ;;  %v994_v32 = vrot.slane %v993_v20, 2  ;;  %v1005_v33 = vmax.f32 %v947_v13, %v1004_v21  ;;  %v1017_v34 = vmax.f32 %v949_v14, %v1016_v22  ;;  %v844_v35 = vpop.f32.mrb[14].mxu0  ;;  %v917_v36 = vpop.f32.mrb[14].mxu1 }
 0x2d6   : > { %v977_v37 = vmax.f32 %v975_v15, %v976_v25  ;;  %v989_v38 = vmax.f32 %v987_v16, %v988_v26  ;;  %v1000_v39 = vrot.slane %v999_v27, 2  ;;  %v1012_v40 = vrot.slane %v1011_v28, 2  ;;  %v846_v41 = vpop.f32.mrb[15].mxu0  ;;  %v919_v42 = vpop.f32.mrb[15].mxu1 }
 0x2d7   : > { %v983_v43 = vmax.f32 %v981_v19, %v982_v31  ;;  %v995_v44 = vmax.f32 %v993_v20, %v994_v32  ;;  %v1006_v45 = vrot.slane %v1005_v33, 2  ;;  %v1018_v46 = vrot.slane %v1017_v34, 2 }
 0x2d8   : > { %v978_v51 = vrot.slane %v977_v37, 1  ;;  %v990_v52 = vrot.slane %v989_v38, 1  ;;  %v1001_v53 = vmax.f32 %v999_v27, %v1000_v39  ;;  %v1013_v54 = vmax.f32 %v1011_v28, %v1012_v40 }
 0x2d9   : > { %v984_v55 = vrot.slane %v983_v43, 1  ;;  %v996_v56 = vrot.slane %v995_v44, 1  ;;  %v1007_v57 = vmax.f32 %v1005_v33, %v1006_v45  ;;  %v1019_v58 = vmax.f32 %v1017_v34, %v1018_v46 }
 0x2da   : > { %v979_v59 = vmax.f32 %v977_v37, %v978_v51  ;;  %v991_v60 = vmax.f32 %v989_v38, %v990_v52  ;;  %v1002_v61 = vrot.slane %v1001_v53, 1  ;;  %v1014_v62 = vrot.slane %v1013_v54, 1 }
 0x2db   : > { %v985_v63 = vmax.f32 %v983_v43, %v984_v55  ;;  %v997_v0 = vmax.f32 %v995_v44, %v996_v56  ;;  %v1008_v1 = vrot.slane %v1007_v57, 1  ;;  %v1020_v2 = vrot.slane %v1019_v58, 1  ;;  %v1824_v3 = vpop.f32.mrb[16].mxu0  ;;  %v1826_v4 = vpop.f32.mrb[16].mxu1 }
 0x2dc   : > { %v1003_v5 = vmax.f32 %v1001_v53, %v1002_v61  ;;  %v1015_v6 = vmax.f32 %v1013_v54, %v1014_v62  ;;  %v841_v7 = vadd.f32 %v840_v23, %v1808_v47  ;;  %v914_v8 = vadd.f32 %v913_v24, %v1810_v48  ;;  %v1830_v9 = vpop.f32.mrb[17].mxu0  ;;  %v1832_v10 = vpop.f32.mrb[17].mxu1 }
 0x2dd   : > { %v1009_v11 = vmax.f32 %v1007_v57, %v1008_v1  ;;  %v1021_v12 = vmax.f32 %v1019_v58, %v1020_v2  ;;  %v843_v13 = vadd.f32 %v842_v29, %v1812_v49  ;;  %v916_v14 = vadd.f32 %v915_v30, %v1814_v50  ;;  %v1836_v15 = vpop.f32.mrb[18].mxu0  ;;  %v1838_v16 = vpop.f32.mrb[18].mxu1 }
 0x2de   : > { %v1841_v17 = vsel %vm1198_vm2, %v1003_v5, %v979_v59  ;;  %v1844_v18 = vsel %vm1198_vm2, %v1015_v6, %v991_v60  ;;  %v950_v19 = vmax.f32 %v841_v7, 0.0  ;;  %v952_v20 = vmax.f32 %v914_v8, 0.0  ;;  %v1846_v21 = vpop.f32.mrb[19].mxu0  ;;  %v1848_v22 = vpop.f32.mrb[19].mxu1 }
 0x2df   : > { %v1851_v23 = vsel %vm1198_vm2, %v1009_v11, %v985_v63  ;;  %v1854_v24 = vsel %vm1198_vm2, %v1021_v12, %v997_v0  ;;  %v951_v25 = vmax.f32 %v843_v13, 0.0  ;;  %v953_v26 = vmax.f32 %v916_v14, 0.0 }
 0x2e0   : > { %v1022_v27 = vrot.slane %v950_v19, 4  ;;  %v1034_v28 = vrot.slane %v952_v20, 4  ;;  %v845_v29 = vadd.f32 %v844_v35, %v1808_v47  ;;  %v918_v30 = vadd.f32 %v917_v36, %v1810_v48 }
 0x2e1   : > { %v1028_v31 = vrot.slane %v951_v25, 4  ;;  %v1040_v32 = vrot.slane %v953_v26, 4  ;;  %v847_v33 = vadd.f32 %v846_v41, %v1812_v49  ;;  %v920_v34 = vadd.f32 %v919_v42, %v1814_v50 }
 0x2e2   : > { %v1023_v37 = vmax.f32 %v950_v19, %v1022_v27  ;;  %v1035_v38 = vmax.f32 %v952_v20, %v1034_v28  ;;  %v954_v39 = vmax.f32 %v845_v29, 0.0  ;;  %v956_v40 = vmax.f32 %v918_v30, 0.0 }
 0x2e3   : > { %v1029_v43 = vmax.f32 %v951_v25, %v1028_v31  ;;  %v1041_v44 = vmax.f32 %v953_v26, %v1040_v32  ;;  %v955_v45 = vmax.f32 %v847_v33, 0.0  ;;  %v957_v46 = vmax.f32 %v920_v34, 0.0  ;;  %v1860_v51 = vpop.f32.mrb[20].mxu0  ;;  %v1862_v35 = vpop.f32.mrb[20].mxu1 }
 0x2e4   : > { %v1024_v36 = vrot.slane %v1023_v37, 2  ;;  %v1036_v52 = vrot.slane %v1035_v38, 2  ;;  %v1046_v53 = vrot.slane %v954_v39, 4  ;;  %v1058_v54 = vrot.slane %v956_v40, 4  ;;  %v1864_v55 = vpop.f32.mrb[21].mxu0  ;;  %v1866_v41 = vpop.f32.mrb[21].mxu1 }
 0x2e5   : > { %v1030_v42 = vrot.slane %v1029_v43, 2  ;;  %v1042_v56 = vrot.slane %v1041_v44, 2  ;;  %v1052_v57 = vrot.slane %v955_v45, 4  ;;  %v1064_v58 = vrot.slane %v957_v46, 4  ;;  %v1868_v59 = vpop.f32.mrb[22].mxu0  ;;  %v1870_v60 = vpop.f32.mrb[22].mxu1 }
 0x2e6   : > { %v1025_v61 = vmax.f32 %v1023_v37, %v1024_v36  ;;  %v1037_v62 = vmax.f32 %v1035_v38, %v1036_v52  ;;  %v1047_v63 = vmax.f32 %v954_v39, %v1046_v53  ;;  %v1059_v0 = vmax.f32 %v956_v40, %v1058_v54  ;;  %v1872_v1 = vpop.f32.mrb[23].mxu0  ;;  %v1874_v2 = vpop.f32.mrb[23].mxu1 }
 0x2e7   : > { %v1031_v5 = vmax.f32 %v1029_v43, %v1030_v42  ;;  %v1043_v6 = vmax.f32 %v1041_v44, %v1042_v56  ;;  %v1053_v7 = vmax.f32 %v955_v45, %v1052_v57  ;;  %v1065_v8 = vmax.f32 %v957_v46, %v1064_v58 }
 0x2e8   : > { %v1026_v11 = vrot.slane %v1025_v61, 1  ;;  %v1038_v12 = vrot.slane %v1037_v62, 1  ;;  %v1048_v13 = vrot.slane %v1047_v63, 2  ;;  %v1060_v14 = vrot.slane %v1059_v0, 2 }
 0x2e9   : > { %v1032_v19 = vrot.slane %v1031_v5, 1  ;;  %v1044_v20 = vrot.slane %v1043_v6, 1  ;;  %v1054_v25 = vrot.slane %v1053_v7, 2  ;;  %v1066_v26 = vrot.slane %v1065_v8, 2 }
 0x2ea   : > { %v1027_v27 = vmax.f32 %v1025_v61, %v1026_v11  ;;  %v1039_v28 = vmax.f32 %v1037_v62, %v1038_v12  ;;  %v1049_v29 = vmax.f32 %v1047_v63, %v1048_v13  ;;  %v1061_v30 = vmax.f32 %v1059_v0, %v1060_v14 }
 0x2eb   : > { %v1033_v31 = vmax.f32 %v1031_v5, %v1032_v19  ;;  %v1045_v32 = vmax.f32 %v1043_v6, %v1044_v20  ;;  %v1055_v33 = vmax.f32 %v1053_v7, %v1054_v25  ;;  %v1067_v34 = vmax.f32 %v1065_v8, %v1066_v26 }
 0x2ec   : > { %v1201_v37 = vsel %vm1200_vm3, %v1027_v27, %v1841_v17  ;;  %v1220_v38 = vsel %vm1200_vm3, %v1039_v28, %v1844_v18  ;;  %v1050_v39 = vrot.slane %v1049_v29, 1  ;;  %v1062_v40 = vrot.slane %v1061_v30, 1 }
 0x2ed   : > { %v1213_v43 = vsel %vm1200_vm3, %v1033_v31, %v1851_v23  ;;  %v1227_v44 = vsel %vm1200_vm3, %v1045_v32, %v1854_v24  ;;  %v1056_v45 = vrot.slane %v1055_v33, 1  ;;  %v1068_v46 = vrot.slane %v1067_v34, 1 }
 0x2ee   : > { %v1051_v36 = vmax.f32 %v1049_v29, %v1050_v39  ;;  %v1063_v52 = vmax.f32 %v1061_v30, %v1062_v40  ;;  %v851_v53 = vadd.f32 %v1824_v3, %v1808_v47  ;;  %v924_v17 = vadd.f32 %v1826_v4, %v1810_v48 }
 0x2ef   : > { %v1057_v54 = vmax.f32 %v1055_v33, %v1056_v45  ;;  %v1069_v18 = vmax.f32 %v1067_v34, %v1068_v46  ;;  %v853_v42 = vadd.f32 %v1830_v9, %v1812_v49  ;;  %v926_v23 = vadd.f32 %v1832_v10, %v1814_v50 }
 0x2f0   : > { %v1203_v24 = vsel %vm1202_vm4, %v1051_v36, %v1201_v37  ;;  %v1221_v56 = vsel %vm1202_vm4, %v1063_v52, %v1220_v38  ;;  %v958_v57 = vmax.f32 %v851_v53, 0.0  ;;  %v960_v58 = vmax.f32 %v924_v17, 0.0 }
 0x2f1   : > { %v1214_v61 = vsel %vm1202_vm4, %v1057_v54, %v1213_v43  ;;  %v1228_v3 = vsel %vm1202_vm4, %v1069_v18, %v1227_v44  ;;  %v959_v62 = vmax.f32 %v853_v42, 0.0  ;;  %v961_v4 = vmax.f32 %v926_v23, 0.0 }
 0x2f2   : > { %v1070_v63 = vrot.slane %v958_v57, 4  ;;  %v1082_v0 = vrot.slane %v960_v58, 4  ;;  %v855_v9 = vadd.f32 %v1836_v15, %v1808_v47  ;;  %v928_v10 = vadd.f32 %v1838_v16, %v1810_v48 }
 0x2f3   : > { %v1076_v5 = vrot.slane %v959_v62, 4  ;;  %v1088_v6 = vrot.slane %v961_v4, 4  ;;  %v857_v7 = vadd.f32 %v1846_v21, %v1812_v49  ;;  %v930_v8 = vadd.f32 %v1848_v22, %v1814_v50 }
 0x2f4   : > { %v1071_v11 = vmax.f32 %v958_v57, %v1070_v63  ;;  %v1083_v12 = vmax.f32 %v960_v58, %v1082_v0  ;;  %v962_v13 = vmax.f32 %v855_v9, 0.0  ;;  %v964_v14 = vmax.f32 %v928_v10, 0.0 }
 0x2f5   : > { %v1077_v19 = vmax.f32 %v959_v62, %v1076_v5  ;;  %v1089_v20 = vmax.f32 %v961_v4, %v1088_v6  ;;  %v963_v25 = vmax.f32 %v857_v7, 0.0  ;;  %v965_v15 = vmax.f32 %v930_v8, 0.0 }
 0x2f6   : > { %v1072_v26 = vrot.slane %v1071_v11, 2  ;;  %v1084_v27 = vrot.slane %v1083_v12, 2  ;;  %v1094_v16 = vrot.slane %v962_v13, 4  ;;  %v1106_v28 = vrot.slane %v964_v14, 4 }
 0x2f7   : > { %v1078_v29 = vrot.slane %v1077_v19, 2  ;;  %v1090_v30 = vrot.slane %v1089_v20, 2  ;;  %v1100_v31 = vrot.slane %v963_v25, 4  ;;  %v1112_v21 = vrot.slane %v965_v15, 4 }
 0x2f8   : > { %v1073_v32 = vmax.f32 %v1071_v11, %v1072_v26  ;;  %v1085_v33 = vmax.f32 %v1083_v12, %v1084_v27  ;;  %v1095_v22 = vmax.f32 %v962_v13, %v1094_v16  ;;  %v1107_v34 = vmax.f32 %v964_v14, %v1106_v28 }
 0x2f9   : > { %v1079_v37 = vmax.f32 %v1077_v19, %v1078_v29  ;;  %v1091_v38 = vmax.f32 %v1089_v20, %v1090_v30  ;;  %v1101_v39 = vmax.f32 %v963_v25, %v1100_v31  ;;  %v1113_v40 = vmax.f32 %v965_v15, %v1112_v21 }
 0x2fa   : > { %v1074_v43 = vrot.slane %v1073_v32, 1  ;;  %v1086_v44 = vrot.slane %v1085_v33, 1  ;;  %v1096_v45 = vrot.slane %v1095_v22, 2  ;;  %v1108_v46 = vrot.slane %v1107_v34, 2 }
 0x2fb   : > { %v1080_v36 = vrot.slane %v1079_v37, 1  ;;  %v1092_v52 = vrot.slane %v1091_v38, 1  ;;  %v1102_v53 = vrot.slane %v1101_v39, 2  ;;  %v1114_v17 = vrot.slane %v1113_v40, 2 }
 0x2fc   : > { %v1075_v54 = vmax.f32 %v1073_v32, %v1074_v43  ;;  %v1087_v18 = vmax.f32 %v1085_v33, %v1086_v44  ;;  %v1097_v42 = vmax.f32 %v1095_v22, %v1096_v45  ;;  %v1109_v23 = vmax.f32 %v1107_v34, %v1108_v46 }
 0x2fd   : > { %v1081_v57 = vmax.f32 %v1079_v37, %v1080_v36  ;;  %v1093_v58 = vmax.f32 %v1091_v38, %v1092_v52  ;;  %v1103_v62 = vmax.f32 %v1101_v39, %v1102_v53  ;;  %v1115_v4 = vmax.f32 %v1113_v40, %v1114_v17 }
 0x2fe   : > { %v1205_v63 = vsel %vm1204_vm5, %v1075_v54, %v1203_v24  ;;  %v1222_v0 = vsel %vm1204_vm5, %v1087_v18, %v1221_v56  ;;  %v1098_v9 = vrot.slane %v1097_v42, 1  ;;  %v1110_v10 = vrot.slane %v1109_v23, 1 }
 0x2ff   : > { %v1215_v5 = vsel %vm1204_vm5, %v1081_v57, %v1214_v61  ;;  %v1229_v6 = vsel %vm1204_vm5, %v1093_v58, %v1228_v3  ;;  %v1104_v7 = vrot.slane %v1103_v62, 1  ;;  %v1116_v8 = vrot.slane %v1115_v4, 1 }
 0x300   : > { %v1099_v11 = vmax.f32 %v1097_v42, %v1098_v9  ;;  %v1111_v12 = vmax.f32 %v1109_v23, %v1110_v10  ;;  %v861_v13 = vadd.f32 %v1860_v51, %v1808_v47  ;;  %v934_v14 = vadd.f32 %v1862_v35, %v1810_v48 }
 0x301   : > { %v1105_v19 = vmax.f32 %v1103_v62, %v1104_v7  ;;  %v1117_v24 = vmax.f32 %v1115_v4, %v1116_v8  ;;  %v863_v56 = vadd.f32 %v1864_v55, %v1812_v49  ;;  %v936_v61 = vadd.f32 %v1866_v41, %v1814_v50 }
 0x302   : > { %v1207_v3 = vsel %vm1206_vm6, %v1099_v11, %v1205_v63  ;;  %v1223_v20 = vsel %vm1206_vm6, %v1111_v12, %v1222_v0  ;;  %v966_v25 = vmax.f32 %v861_v13, 0.0  ;;  %v968_v15 = vmax.f32 %v934_v14, 0.0 }
 0x303   : > { %v1216_v26 = vsel %vm1206_vm6, %v1105_v19, %v1215_v5  ;;  %v1230_v51 = vsel %vm1206_vm6, %v1117_v24, %v1229_v6  ;;  %v967_v27 = vmax.f32 %v863_v56, 0.0  ;;  %v969_v35 = vmax.f32 %v936_v61, 0.0 }
 0x304   : > { %v1118_v16 = vrot.slane %v966_v25, 4  ;;  %v1130_v28 = vrot.slane %v968_v15, 4  ;;  %v865_v55 = vadd.f32 %v1868_v59, %v1808_v47  ;;  %v938_v41 = vadd.f32 %v1870_v60, %v1810_v48 }
 0x305   : > { %v1124_v29 = vrot.slane %v967_v27, 4  ;;  %v1136_v30 = vrot.slane %v969_v35, 4  ;;  %v867_v31 = vadd.f32 %v1872_v1, %v1812_v49  ;;  %v940_v21 = vadd.f32 %v1874_v2, %v1814_v50 }
 0x306   : > { %v1119_v32 = vmax.f32 %v966_v25, %v1118_v16  ;;  %v1131_v33 = vmax.f32 %v968_v15, %v1130_v28  ;;  %v970_v22 = vmax.f32 %v865_v55, 0.0  ;;  %v972_v34 = vmax.f32 %v938_v41, 0.0 }
 0x307   : > { %v1125_v37 = vmax.f32 %v967_v27, %v1124_v29  ;;  %v1137_v38 = vmax.f32 %v969_v35, %v1136_v30  ;;  %v971_v47 = vmax.f32 %v867_v31, 0.0  ;;  %v973_v59 = vmax.f32 %v940_v21, 0.0 }
 0x308   : > { %v1120_v39 = vrot.slane %v1119_v32, 2  ;;  %v1132_v48 = vrot.slane %v1131_v33, 2  ;;  %v1142_v60 = vrot.slane %v970_v22, 4  ;;  %v1154_v40 = vrot.slane %v972_v34, 4 }
 0x309   : > { %v1126_v43 = vrot.slane %v1125_v37, 2  ;;  %v1138_v44 = vrot.slane %v1137_v38, 2  ;;  %v1148_v49 = vrot.slane %v971_v47, 4  ;;  %v1160_v1 = vrot.slane %v973_v59, 4 }
 0x30a   : > { %v1121_v50 = vmax.f32 %v1119_v32, %v1120_v39  ;;  %v1133_v2 = vmax.f32 %v1131_v33, %v1132_v48  ;;  %v1143_v45 = vmax.f32 %v970_v22, %v1142_v60  ;;  %v1155_v46 = vmax.f32 %v972_v34, %v1154_v40 }
 0x30b   : > { %v1127_v36 = vmax.f32 %v1125_v37, %v1126_v43  ;;  %v1139_v52 = vmax.f32 %v1137_v38, %v1138_v44  ;;  %v1149_v53 = vmax.f32 %v971_v47, %v1148_v49  ;;  %v1161_v17 = vmax.f32 %v973_v59, %v1160_v1 }
 0x30c   : > { %v1122_v54 = vrot.slane %v1121_v50, 1  ;;  %v1134_v18 = vrot.slane %v1133_v2, 1  ;;  %v1144_v42 = vrot.slane %v1143_v45, 2  ;;  %v1156_v23 = vrot.slane %v1155_v46, 2 }
 0x30d   : > { %v1128_v57 = vrot.slane %v1127_v36, 1  ;;  %v1140_v58 = vrot.slane %v1139_v52, 1  ;;  %v1150_v62 = vrot.slane %v1149_v53, 2  ;;  %v1162_v4 = vrot.slane %v1161_v17, 2 }
 0x30e   : > { %v1123_v63 = vmax.f32 %v1121_v50, %v1122_v54  ;;  %v1135_v0 = vmax.f32 %v1133_v2, %v1134_v18  ;;  %v1145_v9 = vmax.f32 %v1143_v45, %v1144_v42  ;;  %v1157_v10 = vmax.f32 %v1155_v46, %v1156_v23 }
 0x30f   : > { %v1129_v5 = vmax.f32 %v1127_v36, %v1128_v57  ;;  %v1141_v6 = vmax.f32 %v1139_v52, %v1140_v58  ;;  %v1151_v7 = vmax.f32 %v1149_v53, %v1150_v62  ;;  %v1163_v8 = vmax.f32 %v1161_v17, %v1162_v4 }
 0x310   : > { %v1209_v11 = vsel %vm1208_vm7, %v1123_v63, %v1207_v3  ;;  %v1224_v12 = vsel %vm1208_vm7, %v1135_v0, %v1223_v20  ;;  %v1146_v13 = vrot.slane %v1145_v9, 1  ;;  %v1158_v14 = vrot.slane %v1157_v10, 1 }
 0x311   : > { %v1217_v19 = vsel %vm1208_vm7, %v1129_v5, %v1216_v26  ;;  %v1231_v24 = vsel %vm1208_vm7, %v1141_v6, %v1230_v51  ;;  %v1152_v56 = vrot.slane %v1151_v7, 1  ;;  %v1164_v61 = vrot.slane %v1163_v8, 1 }
 0x312   : > { %v1147_v25 = vmax.f32 %v1145_v9, %v1146_v13  ;;  %v1159_v15 = vmax.f32 %v1157_v10, %v1158_v14 }
 0x313   : > { %v1153_v27 = vmax.f32 %v1151_v7, %v1152_v56  ;;  %v1165_v35 = vmax.f32 %v1163_v8, %v1164_v61 }
 0x314   : > { %v1211_v3 = vsel %vm1210_vm8, %v1147_v25, %v1209_v11  ;;  %v1225_v20 = vsel %vm1210_vm8, %v1159_v15, %v1224_v12 }
 0x315   : > { %1237 = vst [vmem:[%s287_s8] sm:$0xff] %v1211_v3  ;;  %1239 = vst [vmem:[%s287_s8 + $0x10] sm:$0xff] %v1225_v20  ;;  %v1218_v26 = vsel %vm1210_vm8, %v1153_v27, %v1217_v19  ;;  %v1232_v51 = vsel %vm1210_vm8, %v1165_v35, %v1231_v24 }
 0x316   : > { %1238 = vst [vmem:[%s287_s8 + $0x8] sm:$0xff] %v1218_v26  ;;  %1240 = vst [vmem:[%s287_s8 + $0x18] sm:$0xff] %v1232_v51 }
 0x317   : > { %1585 = shalt.err (!%p1582_p7)
}
 0x318   : > { %s1586_s15 = scalar_lea.hbm %s1941_s18, 512  ;;  %s1590_s23 = scalar_lea.hbm %s1994_s7, 1024 }
 0x319   : > { %p1587_p8 = scmp.ne.s32.totalorder %s1941_s18, %s1586_s15  ;;  %p1591_p1 = scmp.lt.u32.totalorder %s1941_s18, %s1994_s7 }
 0x31a   : > { %p1592_p0 = scmp.lt.u32.totalorder %s1590_s23, %s1586_s15  ;;  %p1594_p6 = scmp.lt.u32.totalorder %s1586_s15, %s1941_s18 }
 0x31b   : > { %p1588_p11 = pnand %p1587_p8, %p2005_p9 }
 0x31c   : > { %p1593_p5 = por %p1592_p0, %p1591_p1 }
 0x31d   : > { %p1589_p13 = pneg %p1588_p11 }
 0x31e   : > { %p1595_p10 = por %p1594_p6, %p1593_p5 }
 0x320   : > { %p1596_p12 = pnand %p1595_p10, %p1589_p13 }
 0x322   : > { %1599 = shalt.err (!%p1596_p12)
}
 0x323   : > { %1443 = dma.vmem_to_hbm [thread:$0]  (%p2005_p9), %s1943_s9, 512, %s1941_s18, %s1242_s28  }
 0x324 PF: > { %p1455_p2 = scmp.ge.s32.totalorder %s1638_s27, 2  ;;  %s1268_s14 = sand.u32 1, %s1626_s24  }
 0x325   : > { %p2006_p3 = scmp.ne.s32.totalorder %s1999_s12, 0  ;;  %s1269_s17 = scalar_lea.sflag [#allocation4], %s1268_s14 }
 0x327   : > { %p1450_p4 = pnand %p1455_p2, %p2006_p3 }
 0x329   : > { %1621 = dma.done.wait (!%p1450_p4), %s1269_s17, 512  }
 0x32a   : > { %1623 = vsyncadd (!%p1450_p4), %s1269_s17, 4294966784  ;;  %p18_p7 = scmp.ge.s32.totalorder %s1710_s30, 4   ;;  %s2007_s24 = smov %s1630_s25 }
 0x32b   : > { %s2008_s25 = smov %s1634_s26  ;;  %s2009_s26 = smov %s1721_s10 }
 0x32c   : > { %s2010_s27 = smov %s1710_s30  ;;  %20 = sbr.rel (!%p18_p7) target bundleno = 4 (0x4), region = 88 }
 0x333   :  { %1274 = vsyncpa [#allocation3], 1 }
 0x334   :  { %1276 = vsyncpa [#allocation3 + $0x1], 1 }
 0x335   :  { %1277 = vsyncpa [#allocation4], 1 }
 0x336   :  { %1279 = vsyncpa [#allocation4 + $0x1], 1 }

</bundles_post_ra>
